<compile_context>
chip_gen: v6e
topology: v6e:2x2x1
jax: 0.10.0
libtpu: 0.0.40
codegen_flags: <defaults>
</compile_context>

<pallas_src>
import functools

import jax
import jax.numpy as jnp
from jax.experimental import pallas as pl
from jax.experimental.pallas import tpu as pltpu


def _round_up(x: int, m: int) -> int:
    return -(-x // m) * m


@functools.lru_cache(maxsize=None)
def _tpu_plan():
    """(num_tensorcores, per-input tile bytes, vmem_limit_bytes) for this TPU."""
    kind = ""
    try:
        dev = jax.devices()[0]
        if dev.platform == "tpu":
            kind = dev.device_kind.lower().replace(" ", "")
    except Exception:
        pass
    is_v7x = ("v7" in kind) or ("tpu7" in kind)
    dual_tc = is_v7x or ("v4" in kind) or ("v5p" in kind)
    if is_v7x:
        # 64 MiB physical VMEM: 2 inputs x 2 buffers x 4 MiB = 16 MiB << 32 MiB.
        return 2, 4 << 20, 32 << 20
    # 128 MiB VMEM parts: push tiles further (2 x 2 x 6 MiB = 24 MiB).
    return (2 if dual_tc else 1), 6 << 20, 64 << 20


def _dice_kernel(x_ref, t_ref, inter_ref, den_ref, *,
                 d1, tb, blocks_per_chunk, last_block, mask_last):
    """One grid step: sigmoid + partial sums, accumulated lane-dense.

    x_ref, t_ref : (nb, TB, 128) tiles of the (N, D1, 128) view of the inputs
    inter_ref    : (1, nb, 128) resident block; partial sums of sigmoid(x) * t
    den_ref      : (1, nb, 128) resident block; partial sums of sigmoid(x) + t
    """
    p_idx = pl.program_id(0)   # D-chunk index ("parallel", feeds both TCs on v7x)
    k_idx = pl.program_id(2)   # reduction step within the chunk ("arbitrary")

    @pl.when(k_idx == 0)
    def _():
        inter_ref[...] = jnp.zeros_like(inter_ref)
        den_ref[...] = jnp.zeros_like(den_ref)

    blk = p_idx * blocks_per_chunk + k_idx   # absolute D1 block index

    def _accumulate(masked):
        p = jax.nn.sigmoid(x_ref[...].astype(jnp.float32))
        t = t_ref[...].astype(jnp.float32)
        if masked:
            # Zero rows of the (TB, 128) slab beyond D1 (ragged edge block):
            # that region is whatever the edge DMA left behind, so mask p and t
            # BEFORE they touch the accumulator.
            row = blk * tb + jax.lax.broadcasted_iota(jnp.int32, p.shape, 1)
            valid = row < d1
            p = jnp.where(valid, p, 0.0)
            t = jnp.where(valid, t, 0.0)
        inter_ref[...] += jnp.sum(p * t, axis=1)[None]   # (1, nb, 128)
        den_ref[...] += jnp.sum(p + t, axis=1)[None]     # (1, nb, 128)

    if not mask_last:
        _accumulate(False)
    elif last_block == 0:
        _accumulate(True)                 # single (edge) block
    else:
        # Steady-state blocks run mask-free; only the edge block pays the mask.
        @pl.when(blk == last_block)
        def _():
            _accumulate(True)

        @pl.when(blk != last_block)
        def _():
            _accumulate(False)


def _dice_sums_pallas(x3, t3):
    """Per-row (sum(sigmoid(x)*t), sum(sigmoid(x)) + sum(t)) for the (N, D1, 128)
    view of the (already 128-padded) flattened inputs."""
    n, d1, _ = x3.shape
    itemsize = max(x3.dtype.itemsize, t3.dtype.itemsize)
    num_cores, tile_bytes, vmem_limit = _tpu_plan()

    # ---- batch (N) tiling: keep each input block <= tile_bytes even at TB = 8.
    max_nb = max(8, (tile_bytes // (8 * 128 * itemsize)) // 8 * 8)
    nb = n if n <= max_nb else max_nb
    n_blocks_n = pl.cdiv(n, nb)

    # ---- D1 tiling: ~tile_bytes per input block, TB a multiple of 8.
    if d1 <= 8:
        tb = d1                                   # full-dim block (allowed)
    else:
        tb = tile_bytes // (nb * 128 * itemsize)
        tb = max(8, (tb // 8) * 8)
        tb = min(tb, _round_up(d1, 8))            # no point exceeding D1
    total_blocks = pl.cdiv(d1, tb)

    # ---- D-chunk split across TensorCores (v7x / megacore only), only when it
    # divides the block count evenly so no clamped "virtual" block is ever read.
    num_chunks = 1
    if num_cores > 1 and total_blocks >= 2:
        if total_blocks % 2 == 0:
            num_chunks = 2
        else:
            cand = pl.cdiv(d1, total_blocks + 1)
            tb2 = _round_up(cand, 8)
            if tb2 >= 8 and pl.cdiv(d1, tb2) == total_blocks + 1:
                tb = tb2
                total_blocks = total_blocks + 1
                num_chunks = 2
            # else: keep a single chunk rather than waste a duplicate tile read.
    blocks_per_chunk = total_blocks // num_chunks
    last_block = total_blocks - 1
    mask_last = (d1 % tb) != 0

    def in_map(p, ni, k):
        return (ni, p * blocks_per_chunk + k, 0)

    def out_map(p, ni, k):
        return (p, ni, 0)

    kernel = functools.partial(
        _dice_kernel, d1=d1, tb=tb, blocks_per_chunk=blocks_per_chunk,
        last_block=last_block, mask_last=mask_last)

    out_inter, out_den = pl.pallas_call(
        kernel,
        out_shape=(
            jax.ShapeDtypeStruct((num_chunks, n, 128), jnp.float32),
            jax.ShapeDtypeStruct((num_chunks, n, 128), jnp.float32),
        ),
        grid_spec=pltpu.PrefetchScalarGridSpec(
            num_scalar_prefetch=0,
            grid=(num_chunks, n_blocks_n, blocks_per_chunk),
            in_specs=[
                pl.BlockSpec((nb, tb, 128), in_map),
                pl.BlockSpec((nb, tb, 128), in_map),
            ],
            out_specs=(
                pl.BlockSpec((1, nb, 128), out_map),
                pl.BlockSpec((1, nb, 128), out_map),
            ),
        ),
        compiler_params=pltpu.CompilerParams(
            dimension_semantics=("parallel", "parallel", "arbitrary"),
            vmem_limit_bytes=vmem_limit,
        ),
    )(x3, t3)

    inter = jnp.sum(out_inter, axis=(0, 2))   # (N,)
    den = jnp.sum(out_den, axis=(0, 2))       # (N,)
    return inter, den


@jax.jit
def dice_loss(logits, target):
    """Pallas implementation of DiceLoss.forward (smooth = 1)."""
    n = logits.shape[0]
    x = logits.reshape(n, -1)
    t = target.reshape(n, -1)
    d = x.shape[1]

    d1 = pl.cdiv(d, 128)
    pad = d1 * 128 - d
    if pad:
        # Pad once: sigmoid(most-negative) == 0 and target pad == 0, so the
        # padded columns contribute nothing to any sum.  Single copy, no
        # separate remainder pass.
        if jnp.issubdtype(x.dtype, jnp.floating):
            neg = float(jnp.finfo(x.dtype).min)
        else:
            neg = int(jnp.iinfo(x.dtype).min)
        x = jnp.pad(x, ((0, 0), (0, pad)), constant_values=neg)
        t = jnp.pad(t, ((0, 0), (0, pad)), constant_values=0)

    # Free row-major reshape to a sublane/lane-friendly 3-D view.
    x3 = x.reshape(n, d1, 128)
    t3 = t.reshape(n, d1, 128)

    inter, den = _dice_sums_pallas(x3, t3)

    smooth = jnp.float32(1.0)
    dice = 2.0 * (inter + smooth) / (den + smooth)
    return jnp.float32(1.0) - jnp.sum(dice) / jnp.float32(n)


def _dice_loss_ref(logits, target):
    """Pure-JAX reference mirroring the PyTorch module."""
    probs = jax.nn.sigmoid(logits.astype(jnp.float32))
    n = target.shape[0]
    smooth = 1.0
    input_flat = probs.reshape(n, -1)
    target_flat = target.astype(jnp.float32).reshape(n, -1)
    intersection = input_flat * target_flat
    dice = 2.0 * (intersection.sum(1) + smooth) / (
        input_flat.sum(1) + target_flat.sum(1) + smooth
    )
    return 1.0 - dice.sum() / n


if __name__ == "__main__":
    key = jax.random.PRNGKey(0)
    k1, k2 = jax.random.split(key)

    # 1) NCHW like the PyTorch module: batch=2, channels=4, spatial=16x16
    #    (D = 1024, perfectly 128-aligned -> no pad, single block).
    N, C, H, W = 2, 4, 16, 16
    logits = jax.random.normal(k1, (N, C, H, W), dtype=jnp.float32)
    target = (jax.random.uniform(k2, (N, C, H, W)) > 0.5).astype(jnp.float32)
    loss = jax.block_until_ready(dice_loss(logits, target))
    ref = _dice_loss_ref(logits, target)
    assert jnp.allclose(loss, ref, rtol=1e-5, atol=1e-5), (loss, ref)

    # 2) Ragged case: D = 3*20*20 = 1200 -> padded once to 1280 (D1 = 10),
    #    single masked edge block, no separate remainder pass.
    k3, k4 = jax.random.split(k2)
    logits2 = jax.random.normal(k3, (2, 3, 20, 20), dtype=jnp.float32)
    target2 = (jax.random.uniform(k4, (2, 3, 20, 20)) > 0.5).astype(jnp.float32)
    loss2 = jax.block_until_ready(dice_loss(logits2, target2))
    ref2 = _dice_loss_ref(logits2, target2)
    assert jnp.allclose(loss2, ref2, rtol=1e-5, atol=1e-5), (loss2, ref2)

    # 3) Multi-block reduction path: D = 16*256*256 = 1,048,576 (D1 = 8192)
    #    exercises the pl.when-gated edge mask and multi-step accumulation.
    k5, k6 = jax.random.split(k4)
    logits3 = jax.random.normal(k5, (2, 16, 256, 256), dtype=jnp.float32)
    target3 = (jax.random.uniform(k6, (2, 16, 256, 256)) > 0.5).astype(jnp.float32)
    loss3 = jax.block_until_ready(dice_loss(logits3, target3))
    ref3 = _dice_loss_ref(logits3, target3)
    assert jnp.allclose(loss3, ref3, rtol=1e-4, atol=1e-4), (loss3, ref3)

    print("KERNEL_OK")
</pallas_src>

<mosaic_0001>
module attributes {stable_mosaic.version = 11 : i64} {
  func.func @_dice_kernel(%arg0: i32, %arg1: i32, %arg2: i32, %arg3: memref<2x8x128xf32, #tpu.memory_space<vmem>>, %arg4: memref<2x8x128xf32, #tpu.memory_space<vmem>>, %arg5: memref<1x2x128xf32, #tpu.memory_space<vmem>>, %arg6: memref<1x2x128xf32, #tpu.memory_space<vmem>>) attributes {dimension_semantics = [#tpu.dimension_semantics<parallel>, #tpu.dimension_semantics<parallel>, #tpu.dimension_semantics<arbitrary>], iteration_bounds = array<i64: 1, 1, 1>, scalar_prefetch = 0 : i64, scratch_operands = 0 : i64, tpu.core_type = #tpu.core_type<tc>, window_params = [{transform_indices = @transform_0, window_bounds = array<i64: 2, 8, 128>}, {transform_indices = @transform_1, window_bounds = array<i64: 2, 8, 128>}, {transform_indices = @transform_2, window_bounds = array<i64: 1, 2, 128>}, {transform_indices = @transform_3, window_bounds = array<i64: 1, 2, 128>}]} {
    %c0_i32 = arith.constant 0 : i32
    %0 = arith.cmpi eq, %arg2, %c0_i32 : i32
    %1 = arith.extui %0 : i1 to i32
    %c0_i32_0 = arith.constant 0 : i32
    %2 = arith.cmpi ne, %1, %c0_i32_0 : i32
    scf.if %2 {
      %cst_20 = arith.constant 0.000000e+00 : f32
      %22 = vector.broadcast %cst_20 : f32 to vector<1x2x128xf32>
      %c0_21 = arith.constant 0 : index
      %c0_22 = arith.constant 0 : index
      %c0_23 = arith.constant 0 : index
      %23 = vector.load %arg5[%c0_21, %c0_22, %c0_23] : memref<1x2x128xf32, #tpu.memory_space<vmem>>, vector<1x2x128xf32>
      tpu.vector_store %arg5[%c0_21, %c0_22, %c0_23], %22 {strides = array<i32>} : memref<1x2x128xf32, #tpu.memory_space<vmem>>, vector<1x2x128xf32>,
      %cst_24 = arith.constant 0.000000e+00 : f32
      %24 = vector.broadcast %cst_24 : f32 to vector<1x2x128xf32>
      %c0_25 = arith.constant 0 : index
      %c0_26 = arith.constant 0 : index
      %c0_27 = arith.constant 0 : index
      %25 = vector.load %arg6[%c0_25, %c0_26, %c0_27] : memref<1x2x128xf32, #tpu.memory_space<vmem>>, vector<1x2x128xf32>
      tpu.vector_store %arg6[%c0_25, %c0_26, %c0_27], %24 {strides = array<i32>} : memref<1x2x128xf32, #tpu.memory_space<vmem>>, vector<1x2x128xf32>,
    } else {
    }
    %c0 = arith.constant 0 : index
    %c0_1 = arith.constant 0 : index
    %c0_2 = arith.constant 0 : index
    %3 = vector.load %arg3[%c0, %c0_1, %c0_2] : memref<2x8x128xf32, #tpu.memory_space<vmem>>, vector<2x8x128xf32>
    %4 = arith.negf %3 : vector<2x8x128xf32>
    %5 = math.exp %4 : vector<2x8x128xf32>
    %cst = arith.constant 1.000000e+00 : f32
    %6 = vector.broadcast %cst : f32 to vector<2x8x128xf32>
    %7 = arith.addf %6, %5 : vector<2x8x128xf32>
    %8 = arith.divf %6, %7 : vector<2x8x128xf32>
    %c0_3 = arith.constant 0 : index
    %c0_4 = arith.constant 0 : index
    %c0_5 = arith.constant 0 : index
    %9 = vector.load %arg4[%c0_3, %c0_4, %c0_5] : memref<2x8x128xf32, #tpu.memory_space<vmem>>, vector<2x8x128xf32>
    %c0_6 = arith.constant 0 : index
    %c0_7 = arith.constant 0 : index
    %c0_8 = arith.constant 0 : index
    %10 = vector.load %arg5[%c0_6, %c0_7, %c0_8] : memref<1x2x128xf32, #tpu.memory_space<vmem>>, vector<1x2x128xf32>
    %11 = arith.mulf %8, %9 : vector<2x8x128xf32>
    %cst_9 = arith.constant dense<0.000000e+00> : vector<2x128xf32>
    %12 = vector.multi_reduction <add>, %11, %cst_9 [1] : vector<2x8x128xf32> to vector<2x128xf32>
    %13 = vector.shape_cast %12 : vector<2x128xf32> to vector<1x2x128xf32>
    %14 = arith.addf %10, %13 : vector<1x2x128xf32>
    %c0_10 = arith.constant 0 : index
    %c0_11 = arith.constant 0 : index
    %c0_12 = arith.constant 0 : index
    %15 = vector.load %arg5[%c0_10, %c0_11, %c0_12] : memref<1x2x128xf32, #tpu.memory_space<vmem>>, vector<1x2x128xf32>
    tpu.vector_store %arg5[%c0_10, %c0_11, %c0_12], %14 {strides = array<i32>} : memref<1x2x128xf32, #tpu.memory_space<vmem>>, vector<1x2x128xf32>,
    %c0_13 = arith.constant 0 : index
    %c0_14 = arith.constant 0 : index
    %c0_15 = arith.constant 0 : index
    %16 = vector.load %arg6[%c0_13, %c0_14, %c0_15] : memref<1x2x128xf32, #tpu.memory_space<vmem>>, vector<1x2x128xf32>
    %17 = arith.addf %8, %9 : vector<2x8x128xf32>
    %cst_16 = arith.constant dense<0.000000e+00> : vector<2x128xf32>
    %18 = vector.multi_reduction <add>, %17, %cst_16 [1] : vector<2x8x128xf32> to vector<2x128xf32>
    %19 = vector.shape_cast %18 : vector<2x128xf32> to vector<1x2x128xf32>
    %20 = arith.addf %16, %19 : vector<1x2x128xf32>
    %c0_17 = arith.constant 0 : index
    %c0_18 = arith.constant 0 : index
    %c0_19 = arith.constant 0 : index
    %21 = vector.load %arg6[%c0_17, %c0_18, %c0_19] : memref<1x2x128xf32, #tpu.memory_space<vmem>>, vector<1x2x128xf32>
    tpu.vector_store %arg6[%c0_17, %c0_18, %c0_19], %20 {strides = array<i32>} : memref<1x2x128xf32, #tpu.memory_space<vmem>>, vector<1x2x128xf32>,
    return
  }
  func.func @transform_0(%arg0: i32, %arg1: i32, %arg2: i32) -> (i32, i32, i32) {
    %c1_i32 = arith.constant 1 : i32
    %0 = arith.muli %arg0, %c1_i32 : i32
    %1 = arith.addi %0, %arg2 : i32
    %c0_i32 = arith.constant 0 : i32
    %c0_i32_0 = arith.constant 0 : i32
    return %arg1, %1, %c0_i32 : i32, i32, i32
  }
  func.func @transform_1(%arg0: i32, %arg1: i32, %arg2: i32) -> (i32, i32, i32) {
    %c1_i32 = arith.constant 1 : i32
    %0 = arith.muli %arg0, %c1_i32 : i32
    %1 = arith.addi %0, %arg2 : i32
    %c0_i32 = arith.constant 0 : i32
    %c0_i32_0 = arith.constant 0 : i32
    return %arg1, %1, %c0_i32 : i32, i32, i32
  }
  func.func @transform_2(%arg0: i32, %arg1: i32, %arg2: i32) -> (i32, i32, i32) {
    %c0_i32 = arith.constant 0 : i32
    %c0_i32_0 = arith.constant 0 : i32
    return %arg0, %arg1, %c0_i32 : i32, i32, i32
  }
  func.func @transform_3(%arg0: i32, %arg1: i32, %arg2: i32) -> (i32, i32, i32) {
    %c0_i32 = arith.constant 0 : i32
    %c0_i32_0 = arith.constant 0 : i32
    return %arg0, %arg1, %c0_i32 : i32, i32, i32
  }
}

</mosaic_0001>

<bundles_post_ra>
// kernel: dice_loss.1
= control target key start
LH: loop header
LB: loop body
LE: loop exit
PB: predicated region body
PF: predicated region fallthrough
CT: control target
= control target key end

     0   :  { %v143_v0 = vmov 0.0   ;;  %vm86_vm0 = vcmask 1041409   ;;  %s194_s2 = inlined_call_operand.vmem [shape: f32[1,2,128], index: 2, kind: output, shape index: {0}]   ;;  %s195_s3 = inlined_call_operand.vmem [shape: f32[1,2,128], index: 3, kind: output, shape index: {1}]   ;;  %s196_s0 = inlined_call_operand.vmem [shape: f32[2,8,128], index: 0, kind: input, shape index: {}]   ;;  %s197_s1 = inlined_call_operand.vmem [shape: f32[2,8,128], index: 1, kind: input, shape index: {}]  }
   0x1   :  { %51 = vst [vmem:[%s194_s2] sm:$0x3] %v143_v0  ;;  %52 = vst [vmem:[%s195_s3] sm:$0x3] %v143_v0  ;;  %v53_v1 = vld [vmem:[%s196_s0] sm:$0xff]  ;;  %v54_v2 = vld [vmem:[%s196_s0 + $0x8] sm:$0xff] }
   0x2   :  { %v132_v3 = vmul.f32 -1.442695, %v53_v1  ;;  %v133_v4 = vmul.f32 -1.442695, %v54_v2  ;;  %v67_v9 = vld [vmem:[%s197_s1] sm:$0xff]  ;;  %v68_v10 = vld [vmem:[%s197_s1 + $0x8] sm:$0xff] }
   0x4   :  { %135 = vpow2.f32 %v132_v3 }
   0x5   :  { %137 = vpow2.f32 %v133_v4 }
   0x8   :  { %v69_v39 = vld [vmem:[%s194_s2] sm:$0x3] }
   0x9   :  { %v91_v41 = vld [vmem:[%s195_s3] sm:$0x3] }
  0x11   :  { %v136_v5 = vpop.eup %135 }
  0x12   :  { %v138_v6 = vpop.eup %137  ;;  %v61_v7 = vadd.f32 1.0, %v136_v5 }
  0x13   :  { %v62_v8 = vadd.f32 1.0, %v138_v6 }
  0x14   :  { %139 = vrcp.f32 %v61_v7 }
  0x15   :  { %141 = vrcp.f32 %v62_v8 }
  0x21   :  { %v140_v11 = vpop.eup %139 }
  0x22   :  { %v142_v12 = vpop.eup %141  ;;  %v70_v13 = vmul.f32 %v140_v11, %v67_v9  ;;  %v92_v14 = vadd.f32 %v140_v11, %v67_v9 }
  0x23   :  { %v71_v15 = vmul.f32 %v142_v12, %v68_v10  ;;  %v93_v16 = vadd.f32 %v142_v12, %v68_v10 }
  0x24   :  { %v72_v17 = vrot.slane %v70_v13, 4  ;;  %v94_v18 = vrot.slane %v92_v14, 4 }
  0x25   :  { %v78_v19 = vrot.slane %v71_v15, 4  ;;  %v100_v20 = vrot.slane %v93_v16, 4 }
  0x26   :  { %v73_v21 = vadd.f32 %v72_v17, %v70_v13  ;;  %v95_v22 = vadd.f32 %v94_v18, %v92_v14 }
  0x27   :  { %v79_v23 = vadd.f32 %v78_v19, %v71_v15  ;;  %v101_v24 = vadd.f32 %v100_v20, %v93_v16 }
  0x28   :  { %v74_v25 = vrot.slane %v73_v21, 2  ;;  %v96_v26 = vrot.slane %v95_v22, 2 }
  0x29   :  { %v80_v27 = vrot.slane %v79_v23, 2  ;;  %v102_v28 = vrot.slane %v101_v24, 2 }
  0x2a   :  { %v75_v29 = vadd.f32 %v74_v25, %v73_v21  ;;  %v97_v30 = vadd.f32 %v96_v26, %v95_v22 }
  0x2b   :  { %v81_v31 = vadd.f32 %v80_v27, %v79_v23  ;;  %v103_v32 = vadd.f32 %v102_v28, %v101_v24 }
  0x2c   :  { %v76_v33 = vrot.slane %v75_v29, 1  ;;  %v98_v34 = vrot.slane %v97_v30, 1 }
  0x2d   :  { %v82_v35 = vrot.slane %v81_v31, 1  ;;  %v104_v36 = vrot.slane %v103_v32, 1 }
  0x2e   :  { %v77_v37 = vadd.f32 %v76_v33, %v75_v29  ;;  %v99_v38 = vadd.f32 %v98_v34, %v97_v30 }
  0x2f   :  { %v83_v40 = vadd.f32 %v82_v35, %v81_v31  ;;  %v105_v42 = vadd.f32 %v104_v36, %v103_v32 }
  0x31   :  { %v87_v43 = vsel %vm86_vm0, %v83_v40, %v77_v37  ;;  %v108_v44 = vsel %vm86_vm0, %v105_v42, %v99_v38 }
  0x32   :  { %v89_v45 = vadd.f32 %v87_v43, %v69_v39  ;;  %v110_v46 = vadd.f32 %v108_v44, %v91_v41 }
  0x34   :  { %90 = vst [vmem:[%s194_s2] sm:$0x3] %v89_v45  ;;  %111 = vst [vmem:[%s195_s3] sm:$0x3] %v110_v46 }

</bundles_post_ra>
